<compile_context>
chip_gen: v6e
topology: v6e:2x2x1
jax: 0.10.0
libtpu: 0.0.40
codegen_flags: <defaults>
</compile_context>

<pallas_src>
import math

import numpy as np
import jax
import jax.numpy as jnp
from jax.experimental import pallas as pl
from jax.experimental.pallas import tpu as pltpu


def _gaussian_taps(kernel_size: int = 3, sigma: float = 0.5, dim: int = 2):
    """Mirror of GaussianSmoothing.__init__ (same, non-standard, exponent
    exp(-((x-mean)/(2*sigma))**2) as the PyTorch module)."""
    ks = [kernel_size] * dim
    sg = [sigma] * dim
    grids = np.meshgrid(*[np.arange(s, dtype=np.float32) for s in ks], indexing="ij")
    kernel = np.ones((), dtype=np.float32)
    for size, std, mg in zip(ks, sg, grids):
        mean = (size - 1) / 2.0
        kernel = kernel * (
            1.0 / (std * math.sqrt(2.0 * math.pi))
            * np.exp(-(((mg - mean) / (2.0 * std)) ** 2))
        )
    kernel = (kernel / kernel.sum()).astype(np.float32)
    return kernel  # (KH, KW)


def _sep_pass(x, taps, axis):
    """One 1-D pass of the separable filter along `axis` using circular rolls.

    out[..., i, ...] = sum_j taps[j] * x[..., i+j, ...].  The circular wrap only
    pollutes the last len(taps)-1 positions along `axis`, which the caller never
    stores.  Equal taps (symmetric kernels) are grouped so [a, b, a] costs
    a*(x0+x2) + b*x1.  Rolls stay in the input dtype (bf16 stays packed); the
    f32 upcast happens at the tap multiply, so accumulation is f32.
    """
    extent = x.shape[axis]
    cache = {0: x}

    def shifted(j):
        if j not in cache:
            cache[j] = pltpu.roll(x, shift=(extent - j) % extent, axis=axis)
        return cache[j]

    groups = {}
    for j, t in enumerate(taps):
        groups.setdefault(round(float(t), 12), []).append(j)

    acc = None
    for tap, js in sorted(groups.items(), key=lambda kv: kv[1][0]):
        s = shifted(js[0])
        for j in js[1:]:
            s = s + shifted(j)
        term = s.astype(jnp.float32) * tap        # f32 accumulation from here on
        acc = term if acc is None else acc + term
    return acc


def _make_smoothing_kernel(col_taps, row_taps, tile_p, H, Ho, Wo):
    """col_taps: taps along H (sublane axis); row_taps: taps along W (lane axis)."""
    col_taps = tuple(float(t) for t in col_taps)
    row_taps = tuple(float(t) for t in row_taps)

    def kernel(x_ref, o_ref):
        x = x_ref[...]                           # native dtype, no up-front f32 copy
        tmp = _sep_pass(x, row_taps, axis=1)     # horizontal (lane/W) pass -> f32
        acc = _sep_pass(tmp, col_taps, axis=0)   # vertical (sublane/H) pass -> f32
        # Store only the valid Ho x Wo window of every plane in this block.
        # Wrap-polluted rows/cols and cross-plane contamination are never written.
        for p in range(tile_p):
            o_ref[p * Ho:(p + 1) * Ho, :] = acc[p * H:p * H + Ho, :Wo].astype(o_ref.dtype)

    return kernel


def gaussian_smoothing(x, kernel_size: int = 3, sigma: float = 0.5):
    """Depthwise 2D Gaussian conv, valid padding: (B,C,H,W) -> (B,C,H-K+1,W-K+1)."""
    B, C, H, W = x.shape
    k2d = _gaussian_taps(kernel_size, sigma, dim=2)
    KH, KW = k2d.shape
    # The 2D kernel is rank-1; each 1D factor sums to 1, so row/col sums recover it.
    col_taps = k2d.sum(axis=1)   # along H
    row_taps = k2d.sum(axis=0)   # along W
    Ho, Wo = H - KH + 1, W - KW + 1
    assert Ho >= 1 and Wo >= 1, "input spatial dims must be >= kernel_size"

    P = B * C
    x2d = x.reshape(P * H, W)    # free, row-major contiguous

    itemsize = int(np.dtype(x.dtype).itemsize)
    align = max(8, 32 // itemsize)               # 8 (f32) / 16 (bf16) / 32 (int8)
    budget = 2 * 1024 * 1024                     # ~2 MiB input block: v7x-safe once
                                                 # double buffers + f32 temps counted
    plane_bytes = H * W * itemsize
    tile_p = max(1, min(P, budget // max(plane_bytes, 1)))
    tile_p = min(tile_p, 64)                     # bound the static per-plane store unroll
    if tile_p * 4 > P and P > 1:
        tile_p = max(1, pl.cdiv(P, 4))           # >= ~4 balanced grid steps when it all fits

    def _aligned(t):                             # sublane alignment for in AND out blocks
        return t == P or ((t * H) % align == 0 and (t * Ho) % align == 0)

    while not _aligned(tile_p) and tile_p < P:
        tile_p += 1
    if not _aligned(tile_p):
        tile_p = P
    grid_steps = pl.cdiv(P, tile_p)

    tile_r = tile_p * H
    if grid_steps >= 3:
        try:   # deeper input buffering hides DMA jitter (cheap on v5e/v6e VMEM)
            in_spec = pl.BlockSpec((tile_r, W), lambda i: (i, 0),
                                   pipeline_mode=pl.Buffered(3))
        except TypeError:
            in_spec = pl.BlockSpec((tile_r, W), lambda i: (i, 0))
    else:
        in_spec = pl.BlockSpec((tile_r, W), lambda i: (i, 0))

    out2d = pl.pallas_call(
        _make_smoothing_kernel(col_taps, row_taps, tile_p, H, Ho, Wo),
        out_shape=jax.ShapeDtypeStruct((P * Ho, Wo), x.dtype),
        grid=(grid_steps,),
        in_specs=[in_spec],
        out_specs=pl.BlockSpec((tile_p * Ho, Wo), lambda i: (i, 0)),
        compiler_params=pltpu.CompilerParams(
            dimension_semantics=("parallel",),
            vmem_limit_bytes=48 * 1024 * 1024,
        ),
    )(x2d)

    # (P*Ho, Wo) is already the valid region -> free reshape, no XLA slice pass.
    return out2d.reshape(B, C, Ho, Wo)


if __name__ == "__main__":
    key = jax.random.PRNGKey(0)
    B, C, H, W = 2, 4, 16, 16
    x = jax.random.normal(key, (B, C, H, W), dtype=jnp.float32)

    out = gaussian_smoothing(x, kernel_size=3, sigma=0.5)
    out = jax.block_until_ready(out)

    # Reference: XLA depthwise conv (same semantics as F.conv2d with groups=C).
    k2d = jnp.asarray(_gaussian_taps(3, 0.5, 2))
    w_full = jnp.broadcast_to(k2d[None, None], (C, 1, 3, 3))
    ref = jax.lax.conv_general_dilated(
        x, w_full, window_strides=(1, 1), padding="VALID",
        dimension_numbers=("NCHW", "OIHW", "NCHW"), feature_group_count=C)
    assert out.shape == (B, C, H - 2, W - 2)
    np.testing.assert_allclose(np.asarray(out), np.asarray(ref), rtol=1e-5, atol=1e-5)

    print("KERNEL_OK")
</pallas_src>

<mosaic_0001>
module attributes {stable_mosaic.version = 11 : i64} {
  func.func @kernel(%arg0: i32, %arg1: memref<64x16xf32, #tpu.memory_space<vmem>>, %arg2: memref<56x14xf32, #tpu.memory_space<vmem>>) attributes {dimension_semantics = [#tpu.dimension_semantics<parallel>], iteration_bounds = array<i64: 2>, scalar_prefetch = 0 : i64, scratch_operands = 0 : i64, tpu.core_type = #tpu.core_type<tc>, window_params = [{transform_indices = @transform_0, window_bounds = array<i64: 64, 16>}, {transform_indices = @transform_1, window_bounds = array<i64: 56, 14>}]} {
    %c0 = arith.constant 0 : index
    %c0_0 = arith.constant 0 : index
    %0 = vector.load %arg1[%c0, %c0_0] : memref<64x16xf32, #tpu.memory_space<vmem>>, vector<64x16xf32>
    %c14_i32 = arith.constant 14 : i32
    %1 = tpu.dynamic_rotate %0 by %c14_i32 dim 1 : vector<64x16xf32>, i32 -> vector<64x16xf32>
    %2 = arith.addf %0, %1 : vector<64x16xf32>
    %cst = arith.constant 0.211941555 : f32
    %3 = vector.broadcast %cst : f32 to vector<64x16xf32>
    %4 = arith.mulf %2, %3 : vector<64x16xf32>
    %c15_i32 = arith.constant 15 : i32
    %5 = tpu.dynamic_rotate %0 by %c15_i32 dim 1 : vector<64x16xf32>, i32 -> vector<64x16xf32>
    %cst_1 = arith.constant 0.57611692 : f32
    %6 = vector.broadcast %cst_1 : f32 to vector<64x16xf32>
    %7 = arith.mulf %5, %6 : vector<64x16xf32>
    %8 = arith.addf %4, %7 : vector<64x16xf32>
    %c62_i32 = arith.constant 62 : i32
    %9 = tpu.dynamic_rotate %8 by %c62_i32 dim 0 : vector<64x16xf32>, i32 -> vector<64x16xf32>
    %10 = arith.addf %8, %9 : vector<64x16xf32>
    %cst_2 = arith.constant 0.211941555 : f32
    %11 = vector.broadcast %cst_2 : f32 to vector<64x16xf32>
    %12 = arith.mulf %10, %11 : vector<64x16xf32>
    %c63_i32 = arith.constant 63 : i32
    %13 = tpu.dynamic_rotate %8 by %c63_i32 dim 0 : vector<64x16xf32>, i32 -> vector<64x16xf32>
    %cst_3 = arith.constant 0.57611692 : f32
    %14 = vector.broadcast %cst_3 : f32 to vector<64x16xf32>
    %15 = arith.mulf %13, %14 : vector<64x16xf32>
    %16 = arith.addf %12, %15 : vector<64x16xf32>
    %17 = vector.extract_strided_slice %16 {offsets = [0, 0], sizes = [14, 14], strides = [1, 1]} : vector<64x16xf32> to vector<14x14xf32>
    %c0_4 = arith.constant 0 : index
    %c0_5 = arith.constant 0 : index
    %18 = vector.load %arg2[%c0_4, %c0_5] : memref<56x14xf32, #tpu.memory_space<vmem>>, vector<14x14xf32>
    tpu.vector_store %arg2[%c0_4, %c0_5], %17 {strides = array<i32>} : memref<56x14xf32, #tpu.memory_space<vmem>>, vector<14x14xf32>,
    %19 = vector.extract_strided_slice %16 {offsets = [16, 0], sizes = [14, 14], strides = [1, 1]} : vector<64x16xf32> to vector<14x14xf32>
    %c14 = arith.constant 14 : index
    %c0_6 = arith.constant 0 : index
    %20 = vector.load %arg2[%c14, %c0_6] : memref<56x14xf32, #tpu.memory_space<vmem>>, vector<14x14xf32>
    tpu.vector_store %arg2[%c14, %c0_6], %19 {strides = array<i32>} : memref<56x14xf32, #tpu.memory_space<vmem>>, vector<14x14xf32>,
    %21 = vector.extract_strided_slice %16 {offsets = [32, 0], sizes = [14, 14], strides = [1, 1]} : vector<64x16xf32> to vector<14x14xf32>
    %c28 = arith.constant 28 : index
    %c0_7 = arith.constant 0 : index
    %22 = vector.load %arg2[%c28, %c0_7] : memref<56x14xf32, #tpu.memory_space<vmem>>, vector<14x14xf32>
    tpu.vector_store %arg2[%c28, %c0_7], %21 {strides = array<i32>} : memref<56x14xf32, #tpu.memory_space<vmem>>, vector<14x14xf32>,
    %23 = vector.extract_strided_slice %16 {offsets = [48, 0], sizes = [14, 14], strides = [1, 1]} : vector<64x16xf32> to vector<14x14xf32>
    %c42 = arith.constant 42 : index
    %c0_8 = arith.constant 0 : index
    %24 = vector.load %arg2[%c42, %c0_8] : memref<56x14xf32, #tpu.memory_space<vmem>>, vector<14x14xf32>
    tpu.vector_store %arg2[%c42, %c0_8], %23 {strides = array<i32>} : memref<56x14xf32, #tpu.memory_space<vmem>>, vector<14x14xf32>,
    return
  }
  func.func @transform_0(%arg0: i32) -> (i32, i32) {
    %c0_i32 = arith.constant 0 : i32
    %c0_i32_0 = arith.constant 0 : i32
    return %arg0, %c0_i32 : i32, i32
  }
  func.func @transform_1(%arg0: i32) -> (i32, i32) {
    %c0_i32 = arith.constant 0 : i32
    %c0_i32_0 = arith.constant 0 : i32
    return %arg0, %c0_i32 : i32, i32
  }
}

</mosaic_0001>

<bundles_post_ra>
// kernel: tpu_custom_call.1
= control target key start
LH: loop header
LB: loop body
LE: loop exit
PB: predicated region body
PF: predicated region fallthrough
CT: control target
= control target key end

     0   :  { %s449_s6 = smov 0   ;;  %s621_s0 = inlined_call_operand.vmem [shape: f32[128,16], index: 0, kind: input, shape index: {}]   ;;  %s622_s1 = inlined_call_operand.vmem [shape: f32[112,14], index: 1, kind: output, shape index: {}]  }
   0x1 LB: > { %s407_s7 = sadd.s32 4294967295, %s434_s6   ;;  %p411_p0 = scmp.ge.s32.totalorder %s434_s6, 1  ;;  %s434_s6 = sphi %s449_s6, %s11_s6  }
   0x2   : > { %p88_p1 = scmp.lt.s32.totalorder %s434_s6, 3 }
   0x4   : > { %p89_p2 = pnand %p411_p0, %p88_p1 }
   0x5   : > { %s412_s8 = sshll.u32 (!%p89_p2), %s407_s7, 3  ;;  %s436_s13 = smov (!%p89_p2), 16  }
   0x6   : > { %92 = sbr.rel (%p89_p2) target bundleno = 408 (0x198), region = 24  ;;  %p109_p3 = scmp.lt.s32.totalorder (!%p89_p2), %s412_s8, 15 }
   0x7   : > { %s437_s14 = smov (!%p89_p2), 126   ;;  %s438_s15 = smov (!%p89_p2), 127  }
   0x8   : > { %s114_s16 = smul.u32 (!%p89_p2), 7, %s407_s7 }
   0xa   : > { %p115_p4 = scmp.lt.s32.totalorder (!%p89_p2), %s114_s16, 13 }
   0xb   : > { %s624_s8 = smov (!%p109_p3, %s412_s8), 15  ;;  %vm128_vm0 = vcmask 1047680   ;;  %v281_v56 = vlaneseq  ;;  %vm341_vm3 = vcmask 113664   ;;  %vm343_vm4 = vcmask 111616  }
   0xc   : > { %s413_s9 = sshll.u32 %s624_s8, 3  ;;  %s626_s16 = smov (!%p115_p4, %s114_s16), 13 }
   0xd   : > { %s112_s12 = scalar_lea.vmem %s621_s0, %s413_s9  ;;  %v539_v62 = vshrl.u32 %v281_v56, 7  ;;  %s414_s17 = sshll.u32 %s626_s16, 3 }
   0xe   : > { %v462_v0 = vld [vmem:[%s112_s12] sm:$0xff]  ;;  %v464_v1 = vld [vmem:[%s112_s12 + $0x10] sm:$0xff]  ;;  %v470_v2 = vld [vmem:[%s112_s12 + $0x8] sm:$0xff]  ;;  %s572_s20 = scalar_lea.vmem %s622_s1, %s414_s17 }
   0xf   : > { %129 = vrot.lane.b32.xlu0 %v462_v0, %s436_s13  ;;  %135 = vrot.lane.b32.xlu1 %v464_v1, %s436_s13  ;;  %v472_v3 = vld [vmem:[%s112_s12 + $0x18] sm:$0xff]  ;;  %v478_v4 = vld [vmem:[%s112_s12 + $0x20] sm:$0xff]  ;;  %vm283_vm1 = vcmp.lt.s32.totalorder %v539_v62, 6  ;;  %vm316_vm2 = vcmp.lt.s32.totalorder %v539_v62, 7 }
  0x10   : > { %v480_v5 = vld [vmem:[%s112_s12 + $0x28] sm:$0xff]  ;;  %v486_v6 = vld [vmem:[%s112_s12 + $0x30] sm:$0xff]  ;;  %v488_v7 = vld [vmem:[%s112_s12 + $0x38] sm:$0xff] }
  0x13   : > { %132 = vrot.lane.b32.xlu0 %v470_v2, %s436_s13  ;;  %138 = vrot.lane.b32.xlu1 %v472_v3, %s436_s13 }
  0x17   : > { %141 = vrot.lane.b32.xlu0 %v478_v4, %s436_s13  ;;  %144 = vrot.lane.b32.xlu1 %v480_v5, %s436_s13 }
  0x1b   : > { %147 = vrot.lane.b32.xlu0 %v486_v6, %s436_s13  ;;  %150 = vrot.lane.b32.xlu1 %v488_v7, %s436_s13 }
  0x81   : > { %v130_v8 = vpop.permute.xlu0 %129  ;;  %v136_v9 = vpop.permute.xlu1 %135 }
  0x82   : > { %v131_v10 = vsel %vm128_vm0, %v130_v8, %v462_v0  ;;  %v137_v11 = vsel %vm128_vm0, %v136_v9, %v464_v1 }
  0x83   : > { %153 = vrot.lane.b32.xlu0 %v131_v10, %s436_s13 }
  0x85   : > { %v133_v12 = vpop.permute.xlu0 %132  ;;  %v139_v13 = vpop.permute.xlu1 %138 }
  0x86   : > { %v134_v14 = vsel %vm128_vm0, %v133_v12, %v470_v2  ;;  %v140_v15 = vsel %vm128_vm0, %v139_v13, %v472_v3 }
  0x87   : > { %157 = vrot.lane.b32.xlu0 %v137_v11, %s436_s13  ;;  %155 = vrot.lane.b32.xlu1 %v134_v14, %s436_s13 }
  0x89   : > { %v142_v16 = vpop.permute.xlu0 %141  ;;  %v145_v17 = vpop.permute.xlu1 %144 }
  0x8a   : > { %v143_v18 = vsel %vm128_vm0, %v142_v16, %v478_v4  ;;  %v146_v19 = vsel %vm128_vm0, %v145_v17, %v480_v5 }
  0x8b   : > { %159 = vrot.lane.b32.xlu1 %v140_v15, %s436_s13  ;;  %161 = vrot.lane.b32.xlu0 %v143_v18, %s436_s13 }
  0x8d   : > { %v148_v20 = vpop.permute.xlu0 %147  ;;  %v151_v21 = vpop.permute.xlu1 %150 }
  0x8e   : > { %v149_v22 = vsel %vm128_vm0, %v148_v20, %v486_v6  ;;  %v152_v23 = vsel %vm128_vm0, %v151_v21, %v488_v7 }
  0x8f   : > { %163 = vrot.lane.b32.xlu1 %v146_v19, %s436_s13  ;;  %165 = vrot.lane.b32.xlu0 %v149_v22, %s436_s13 }
  0x93   : > { %167 = vrot.lane.b32.xlu1 %v152_v23, %s436_s13 }
  0xf5   : > { %v154_v24 = vpop.permute.xlu0 %153 }
  0xf6   : > { %v169_v25 = vsel %vm128_vm0, %v154_v24, %v462_v0 }
  0xf7   : > { %185 = vrot.lane.b32.xlu0 %v169_v25, %s437_s14  ;;  %v225_v38 = vmul.f32 0.5761169, %v169_v25 }
  0xf9   : > { %v156_v26 = vpop.permute.xlu1 %155  ;;  %v158_v27 = vpop.permute.xlu0 %157 }
  0xfa   : > { %v170_v28 = vsel %vm128_vm0, %v156_v26, %v470_v2  ;;  %v171_v29 = vsel %vm128_vm0, %v158_v27, %v464_v1 }
  0xfb   : > { %187 = vrot.lane.b32.xlu1 %v170_v28, %s437_s14  ;;  %189 = vrot.lane.b32.xlu0 %v171_v29, %s437_s14  ;;  %v226_v41 = vmul.f32 0.5761169, %v170_v28  ;;  %v227_v42 = vmul.f32 0.5761169, %v171_v29 }
  0xfd   : > { %v160_v30 = vpop.permute.xlu1 %159  ;;  %v162_v31 = vpop.permute.xlu0 %161 }
  0xfe   : > { %v172_v32 = vsel %vm128_vm0, %v160_v30, %v472_v3  ;;  %v173_v33 = vsel %vm128_vm0, %v162_v31, %v478_v4 }
  0xff   : > { %191 = vrot.lane.b32.xlu1 %v172_v32, %s437_s14  ;;  %193 = vrot.lane.b32.xlu0 %v173_v33, %s437_s14  ;;  %v228_v43 = vmul.f32 0.5761169, %v172_v32  ;;  %v229_v44 = vmul.f32 0.5761169, %v173_v33 }
 0x101   : > { %v164_v34 = vpop.permute.xlu1 %163  ;;  %v166_v35 = vpop.permute.xlu0 %165 }
 0x102   : > { %v174_v36 = vsel %vm128_vm0, %v164_v34, %v480_v5  ;;  %v175_v37 = vsel %vm128_vm0, %v166_v35, %v486_v6 }
 0x103   : > { %195 = vrot.lane.b32.xlu1 %v174_v36, %s437_s14  ;;  %197 = vrot.lane.b32.xlu0 %v175_v37, %s437_s14  ;;  %v230_v45 = vmul.f32 0.5761169, %v174_v36  ;;  %v231_v46 = vmul.f32 0.5761169, %v175_v37 }
 0x105   : > { %v168_v39 = vpop.permute.xlu1 %167 }
 0x106   : > { %v176_v40 = vsel %vm128_vm0, %v168_v39, %v488_v7 }
 0x107   : > { %199 = vrot.lane.b32.xlu1 %v176_v40, %s437_s14  ;;  %241 = vrot.lane.b32.xlu0 %v225_v38, %s438_s15  ;;  %v232_v47 = vmul.f32 0.5761169, %v176_v40 }
 0x10b   : > { %243 = vrot.lane.b32.xlu1 %v226_v41, %s438_s15  ;;  %245 = vrot.lane.b32.xlu0 %v227_v42, %s438_s15 }
 0x10f   : > { %247 = vrot.lane.b32.xlu1 %v228_v43, %s438_s15  ;;  %249 = vrot.lane.b32.xlu0 %v229_v44, %s438_s15 }
 0x113   : > { %251 = vrot.lane.b32.xlu1 %v230_v45, %s438_s15  ;;  %253 = vrot.lane.b32.xlu0 %v231_v46, %s438_s15 }
 0x117   : > { %255 = vrot.lane.b32.xlu1 %v232_v47, %s438_s15 }
 0x169   : > { %v186_v48 = vpop.permute.xlu0 %185 }
 0x16a   : > { %v209_v53 = vadd.f32 %v186_v48, %v462_v0 }
 0x16c   : > { %v217_v59 = vmul.f32 0.21194156, %v209_v53 }
 0x16d   : > { %v188_v49 = vpop.permute.xlu1 %187  ;;  %v190_v50 = vpop.permute.xlu0 %189 }
 0x16e   : > { %v210_v57 = vadd.f32 %v188_v49, %v470_v2  ;;  %v211_v58 = vadd.f32 %v190_v50, %v464_v1 }
 0x170   : > { %v218_v8 = vmul.f32 0.21194156, %v210_v57  ;;  %v219_v9 = vmul.f32 0.21194156, %v211_v58 }
 0x171   : > { %v192_v51 = vpop.permute.xlu1 %191  ;;  %v194_v52 = vpop.permute.xlu0 %193 }
 0x172   : > { %v212_v0 = vadd.f32 %v192_v51, %v472_v3  ;;  %v213_v10 = vadd.f32 %v194_v52, %v478_v4 }
 0x174   : > { %v220_v19 = vmul.f32 0.21194156, %v212_v0  ;;  %v221_v20 = vmul.f32 0.21194156, %v213_v10 }
 0x175   : > { %v196_v54 = vpop.permute.xlu1 %195  ;;  %v198_v55 = vpop.permute.xlu0 %197 }
 0x176   : > { %v214_v13 = vadd.f32 %v196_v54, %v480_v5  ;;  %v215_v14 = vadd.f32 %v198_v55, %v486_v6 }
 0x178   : > { %v222_v25 = vmul.f32 0.21194156, %v214_v13  ;;  %v223_v28 = vmul.f32 0.21194156, %v215_v14 }
 0x179   : > { %v200_v60 = vpop.permute.xlu1 %199  ;;  %v242_v61 = vpop.permute.xlu0 %241 }
 0x17a   : > { %v541_v63 = vadd.f32 %v242_v61, %v217_v59  ;;  %v216_v32 = vadd.f32 %v200_v60, %v488_v7 }
 0x17c   : > { %v273_v15 = vrot.slane %v541_v63, 2  ;;  %v308_v16 = vrot.slane %v541_v63, 1  ;;  %v224_v49 = vmul.f32 0.21194156, %v216_v32 }
 0x17d   : > { %v244_v11 = vpop.permute.xlu1 %243  ;;  %v246_v12 = vpop.permute.xlu0 %245 }
 0x17e   : > { %v266_v1 = vadd.f32 %v244_v11, %v218_v8  ;;  %v267_v2 = vadd.f32 %v246_v12, %v219_v9 }
 0x180   : > { %v274_v3 = vrot.slane %v266_v1, 2  ;;  %v309_v4 = vrot.slane %v266_v1, 1  ;;  %v275_v17 = vrot.slane %v267_v2, 2  ;;  %v310_v18 = vrot.slane %v267_v2, 1 }
 0x181   : > { %v248_v21 = vpop.permute.xlu1 %247  ;;  %v250_v22 = vpop.permute.xlu0 %249 }
 0x182   : > { %v290_v5 = vsel %vm283_vm1, %v273_v15, %v274_v3  ;;  %v323_v6 = vsel %vm316_vm2, %v308_v16, %v309_v4  ;;  %v289_v23 = vsel %vm283_vm1, %v274_v3, %v275_v17  ;;  %v322_v24 = vsel %vm316_vm2, %v309_v4, %v310_v18 }
 0x183   : > { %v292_v26 = vadd.f32 %v290_v5, %v541_v63  ;;  %v293_v27 = vadd.f32 %v289_v23, %v266_v1  ;;  %v325_v29 = vmul.f32 0.5761169, %v323_v6  ;;  %v268_v30 = vadd.f32 %v248_v21, %v220_v19 }
 0x184   : > { %v269_v31 = vadd.f32 %v250_v22, %v221_v20  ;;  %v326_v35 = vmul.f32 0.5761169, %v322_v24 }
 0x185   : > { %v300_v33 = vmul.f32 0.21194156, %v292_v26  ;;  %v301_v34 = vmul.f32 0.21194156, %v293_v27  ;;  %v252_v36 = vpop.permute.xlu1 %251  ;;  %v254_v37 = vpop.permute.xlu0 %253  ;;  %v276_v38 = vrot.slane %v268_v30, 2  ;;  %v311_v39 = vrot.slane %v268_v30, 1 }
 0x186   : > { %v277_v40 = vrot.slane %v269_v31, 2  ;;  %v312_v41 = vrot.slane %v269_v31, 1  ;;  %v270_v44 = vadd.f32 %v252_v36, %v222_v25  ;;  %v271_v7 = vadd.f32 %v254_v37, %v223_v28 }
 0x187   : > { %v333_v42 = vadd.f32 %v325_v29, %v300_v33  ;;  %v334_v43 = vadd.f32 %v326_v35, %v301_v34  ;;  %v288_v45 = vsel %vm283_vm1, %v275_v17, %v276_v38  ;;  %v321_v46 = vsel %vm316_vm2, %v310_v18, %v311_v39 }
 0x188   : > { %v287_v47 = vsel %vm283_vm1, %v276_v38, %v277_v40  ;;  %v320_v48 = vsel %vm316_vm2, %v311_v39, %v312_v41  ;;  %v294_v50 = vadd.f32 %v288_v45, %v267_v2  ;;  %v327_v51 = vmul.f32 0.5761169, %v321_v46 }
 0x189   : > { %342 = vst.msk [vmem:[%s572_s20] sm:$0xff] %vm341_vm3, %v333_v42  ;;  %v295_v52 = vadd.f32 %v287_v47, %v268_v30  ;;  %v256_v53 = vpop.permute.xlu1 %255  ;;  %v278_v54 = vrot.slane %v270_v44, 2  ;;  %v313_v55 = vrot.slane %v270_v44, 1  ;;  %v279_v56 = vrot.slane %v271_v7, 2 }
 0x18a   : > { %344 = vst.msk [vmem:[%s572_s20 + $0x8] sm:$0x3f] %vm343_vm4, %v334_v43  ;;  %v314_v57 = vrot.slane %v271_v7, 1  ;;  %v302_v58 = vmul.f32 0.21194156, %v294_v50  ;;  %v272_v61 = vadd.f32 %v256_v53, %v224_v49 }
 0x18b   : > { %v303_v59 = vmul.f32 0.21194156, %v295_v52  ;;  %v328_v60 = vmul.f32 0.5761169, %v320_v48  ;;  %v286_v8 = vsel %vm283_vm1, %v277_v40, %v278_v54  ;;  %v319_v9 = vsel %vm316_vm2, %v312_v41, %v313_v55 }
 0x18c   : > { %v285_v0 = vsel %vm283_vm1, %v278_v54, %v279_v56  ;;  %v318_v10 = vsel %vm316_vm2, %v313_v55, %v314_v57  ;;  %v335_v11 = vadd.f32 %v327_v51, %v302_v58  ;;  %v296_v1 = vadd.f32 %v286_v8, %v269_v31 }
 0x18d   : > { %v336_v12 = vadd.f32 %v328_v60, %v303_v59  ;;  %v297_v2 = vadd.f32 %v285_v0, %v270_v44  ;;  %v280_v13 = vrot.slane %v272_v61, 2  ;;  %v315_v14 = vrot.slane %v272_v61, 1 }
 0x18e   : > { %345 = vst.msk [vmem:[%s572_s20 + $0xe] sm:$0xff] %vm341_vm3, %v335_v11  ;;  %v304_v3 = vmul.f32 0.21194156, %v296_v1  ;;  %v329_v4 = vmul.f32 0.5761169, %v319_v9 }
 0x18f   : > { %v330_v17 = vmul.f32 0.5761169, %v318_v10  ;;  %346 = vst.msk [vmem:[%s572_s20 + $0x16] sm:$0x3f] %vm343_vm4, %v336_v12  ;;  %v305_v18 = vmul.f32 0.21194156, %v297_v2  ;;  %v284_v19 = vsel %vm283_vm1, %v279_v56, %v280_v13  ;;  %v291_v20 = vsel %vm283_vm1, %v280_v13, %v273_v15 }
 0x190   : > { %v317_v21 = vsel %vm316_vm2, %v314_v57, %v315_v14  ;;  %v337_v22 = vadd.f32 %v329_v4, %v304_v3  ;;  %v298_v5 = vadd.f32 %v284_v19, %v271_v7  ;;  %v299_v6 = vadd.f32 %v291_v20, %v272_v61 }
 0x191   : > { %v324_v23 = vsel %vm316_vm2, %v315_v14, %v308_v16  ;;  %v338_v24 = vadd.f32 %v330_v17, %v305_v18  ;;  %v331_v25 = vmul.f32 0.5761169, %v317_v21 }
 0x192   : > { %347 = vst.msk [vmem:[%s572_s20 + $0x1c] sm:$0xff] %vm341_vm3, %v337_v22  ;;  %v306_v26 = vmul.f32 0.21194156, %v298_v5  ;;  %v307_v27 = vmul.f32 0.21194156, %v299_v6 }
 0x193   : > { %v332_v28 = vmul.f32 0.5761169, %v324_v23  ;;  %348 = vst.msk [vmem:[%s572_s20 + $0x24] sm:$0x3f] %vm343_vm4, %v338_v24 }
 0x194   : > { %v339_v15 = vadd.f32 %v331_v25, %v306_v26 }
 0x195   : > { %v340_v29 = vadd.f32 %v332_v28, %v307_v27 }
 0x196   : > { %349 = vst.msk [vmem:[%s572_s20 + $0x2a] sm:$0xff] %vm341_vm3, %v339_v15 }
 0x197   : > { %350 = vst.msk [vmem:[%s572_s20 + $0x32] sm:$0x3f] %vm343_vm4, %v340_v29 }
 0x198 PF: > { %s11_s6 = sadd.s32 1, %s434_s6  }
 0x199   : > { %p8_p5 = scmp.ge.s32.totalorder %s11_s6, 4  }
 0x19b   :  { %10 = sbr.rel (!%p8_p5) target bundleno = 1 (0x1), region = 54 }

</bundles_post_ra>
